<compile_context>
chip_gen: v6e
topology: v6e:2x2x1
jax: 0.10.0
libtpu: 0.0.40
codegen_flags: <defaults>
</compile_context>

<pallas_src>
import math
import numpy as np
import jax
import jax.numpy as jnp
from jax.experimental import pallas as pl
from jax.experimental.pallas import tpu as pltpu


# ----------------------------------------------------------------------------
# Expression parser (trace-time Python, mirrors the include_scale=False path).
# ----------------------------------------------------------------------------
include_scale = False
exclusive_ops = ()                       # original global; only used for a sanity check
max_period = 1.0                         # original global (only needed for coarse chars)
base_kernel_chars = "WR_xlC"             # base kernels supported in this script
# raw_params column layout follows the docstring; include_scale=False indices:
param_idxs = {"W": [], "R": [2], "_": [4, 5], "x": [4], "l": [7], "C": [6]}


def _softplus(x):
    x = float(x)
    return float(np.log1p(np.exp(-abs(x))) + max(x, 0.0))


def _sigmoid(x):
    x = float(x)
    return float(1.0 / (1.0 + np.exp(-x)))


class ParsingError(Exception):
    pass


class KernelParser:
    """Mirrors Kernel.__init__ parsing (include_scale=False). Produces a dict
    tree with concrete Python-float parameters baked in."""

    def __init__(self, expression, raw_params, mean_prior_sd=0.1):
        self.expression = expression
        self.index = 0
        self.raw_params = np.asarray(raw_params)
        self.raw_params_index = 0
        self.params = []
        self.mean_prior_sd = mean_prior_sd
        self.value = self.getValue()

    def getValue(self):
        value = self.parseExpression()
        if self.hasNext():
            raise ParsingError(
                "Unexpected character found: '%s' at index %d" % (self.peek(), self.index)
            )
        return value

    def peek(self):
        return self.expression[self.index : self.index + 1]

    def hasNext(self):
        return self.index < len(self.expression)

    def parseExpression(self):
        return self.parseAddition()

    def parseAddition(self):
        values = [self.parseMultiplication()]
        while self.peek() == "+":
            self.index += 1
            values.append(self.parseMultiplication())
        if len(values) == 1:
            return values[0]
        return {"op": "+", "values": values}

    def parseMultiplication(self):
        values = [self.parseParenthesis()]
        while self.peek() == "*":
            self.index += 1
            values.append(self.parseParenthesis())
        if len(values) == 1:
            return values[0]
        ops = [k["op"] for k in values]
        for op in exclusive_ops:
            if ops.count(op) > 1:
                raise ParsingError("Expression contains more than one " + op)
        return {"op": "*", "values": values}

    def parseParenthesis(self):
        if self.peek() == "(":
            self.index += 1
            value = self.parseExpression()
            if self.peek() != ")":
                raise ParsingError("No closing parenthesis found at character " + str(self.index))
            self.index += 1
            return value
        return self.parseValue()

    def parseValue(self):
        char = self.peek()
        self.index += 1
        raw_param = None
        if self.raw_params_index < len(self.raw_params):
            raw_param = self.raw_params[self.raw_params_index]
            self.raw_params_index += 1
        p = [float(raw_param[i]) for i in param_idxs.get(char, [])]
        if char == "W":
            self.params.append([])
            return {"op": "WhiteNoise"}
        if char == "R":
            lengthscale_sq = _softplus(p[0])
            self.params.append(lengthscale_sq)
            return {"op": "RBF", "lengthscale_sq": lengthscale_sq}
        if char == "_":
            lo, hi = 1.0 / 100.0, 1.0
            period = lo + _sigmoid(p[0]) * (hi - lo)
            lengthscale_sq = _softplus(p[1]) * period
            self.params.append([period, lengthscale_sq])
            return {"op": "ExpSinSq", "period": period, "lengthscale_sq": lengthscale_sq}
        if char == "x":
            lo, hi = 1.0 / 100.0, 1.0
            period = lo + _sigmoid(p[0]) * (hi - lo)
            self.params.append([period])
            return {"op": "Cosine", "period": period}
        if char == "l":
            lo, hi = -0.5, 1.5
            offset = lo + _sigmoid(p[0]) * (hi - lo)
            self.params.append(offset)
            return {"op": "Linear", "offset": offset}
        if char == "C":
            value = _softplus(p[0])
            self.params.append(value)
            return {"op": "Constant", "value": value}
        # TODO(synk): coarse-binned period/offset chars ('1'-'0', 'a'-'j', 'm'-'v')
        # need the coarse_params machinery; not exercised here.
        raise ParsingError("Cannot parse char: " + str(char))


# ----------------------------------------------------------------------------
# Optimized in-kernel evaluator (traced inside the Pallas kernel body).
# Semantics match Kernel.forward exactly, including the top_level /
# mean_prior_sd**2 quirks; only exact algebraic rewrites are applied.
# Scalar ('Constant' / all-scalar) subexpressions are folded at trace time.
# ----------------------------------------------------------------------------
def _maybe_cast(x, ctx):
    td = ctx.get("tdtype")
    return x if td is None else x.astype(td)


def _leaf_log(node, ctx):
    """Exp-argument for pure-exponential leaves (RBF / ExpSinSq); else None.
    Constants are baked as reciprocal multipliers at trace time."""
    op = node["op"]
    if op == "RBF":
        d = _maybe_cast(ctx["d"], ctx)
        neg_inv_2l2 = -1.0 / (2.0 * node["lengthscale_sq"])
        return (d * d) * neg_inv_2l2
    if op == "ExpSinSq":
        d = _maybe_cast(ctx["d"], ctx)
        pi_over_t = math.pi / node["period"]
        neg_2_over_l2 = -2.0 / node["lengthscale_sq"]
        s = jnp.sin(d * pi_over_t)          # |d| dropped: sin^2 is even
        return (s * s) * neg_2_over_l2
    return None


def _eval_leaf(node, ctx):
    op = node["op"]
    d, x1, x2 = ctx["d"], ctx["x1"], ctx["x2"]
    log_arg = _leaf_log(node, ctx)
    if log_arg is not None:
        return jnp.exp(log_arg).astype(jnp.float32)
    if op == "Linear":
        c = node["offset"]
        return (x1 - c) * (x2 - c)
    if op == "WhiteNoise":
        # Faithful to the reference's exact float equality semantics.
        return (x1 == x2).astype(jnp.float32)
    if op == "Cosine":
        two_pi_over_t = 2.0 * math.pi / node["period"]
        dd = _maybe_cast(d, ctx)
        return jnp.cos(dd * two_pi_over_t).astype(jnp.float32)   # |d| dropped: cos is even
    if op == "Constant":
        return float(node["value"])          # folded at trace time
    raise ParsingError("Cannot parse kernel op " + str(op))


def _eval_product(values, ctx, sd2):
    """'*' branch. Reference semantics: first factor gets NO +sd^2, every later
    factor gets +sd^2 (top_level=True default). Pure-exponential factors that
    carry no additive offset are fused exp(a)*exp(b) -> exp(a+b)."""
    fused_log = None
    arr = None
    scalar = None

    for idx, v in enumerate(values):
        carries_sd2 = idx > 0
        log_arg = None
        if (not carries_sd2) or sd2 == 0.0:
            log_arg = _leaf_log(v, ctx)
        if log_arg is not None:
            fused_log = log_arg if fused_log is None else fused_log + log_arg
            continue
        factor = _eval_tree(v, ctx, sd2, top_level=carries_sd2)
        if isinstance(factor, float):
            scalar = factor if scalar is None else scalar * factor
        else:
            arr = factor if arr is None else arr * factor

    if fused_log is not None:
        e = jnp.exp(fused_log).astype(jnp.float32)
        arr = e if arr is None else arr * e
    if arr is None:
        return scalar if scalar is not None else 1.0
    if scalar is not None:
        arr = arr * scalar
    return arr


def _eval_tree(node, ctx, sd2, top_level=True):
    """Returns a jnp array or a Python float (trace-time folded scalar)."""
    op = node["op"]
    pending_scalar = 0.0
    if op == "+":
        parts = [_eval_tree(node["values"][0], ctx, sd2, top_level=True)]
        parts += [_eval_tree(v, ctx, sd2, top_level=False) for v in node["values"][1:]]
        arr = None
        for p in parts:
            if isinstance(p, float):
                pending_scalar += p
            else:
                arr = p if arr is None else arr + p
        result = arr
    elif op == "*":
        result = _eval_product(node["values"], ctx, sd2)
        if isinstance(result, float):
            pending_scalar += result
            result = None
    else:
        result = _eval_leaf(node, ctx)
        if isinstance(result, float):
            pending_scalar += result
            result = None
    if top_level:
        pending_scalar += sd2
    if result is None:
        return pending_scalar
    if pending_scalar != 0.0:
        result = result + pending_scalar
    return result


def make_cov_kernel(tree, mean_prior_sd, transcendental_dtype=None):
    """transcendental_dtype=jnp.bfloat16 halves EUP time on v6e/v7x (accuracy
    flag; keep None/f32 on v5e and when 1e-5 accuracy is required)."""
    sd2 = float(mean_prior_sd) ** 2

    def cov_kernel(x1_ref, x2_ref, o_ref):
        x1 = x1_ref[...]
        x2 = x2_ref[...]
        d = x1 - x2               # hoisted shared difference
        ctx = {"x1": x1, "x2": x2, "d": d, "tdtype": transcendental_dtype}
        result = _eval_tree(tree, ctx, sd2, top_level=True)
        if isinstance(result, float):
            o_ref[...] = jnp.full(o_ref.shape, result, dtype=o_ref.dtype)
        else:
            o_ref[...] = result.astype(o_ref.dtype)

    return cov_kernel


# ----------------------------------------------------------------------------
# Tile selection (generation-aware) + pallas_call wrappers
# ----------------------------------------------------------------------------
def _cdiv(a, b):
    return -(-a // b)


def _round_up(a, b):
    return _cdiv(a, b) * b


def _tpu_generation_info():
    """(vmem_capacity_bytes, num_tensorcores) with conservative fallbacks."""
    vmem_cap = 64 << 20        # conservative (v7x) default
    num_cores = 2              # erring high only adds a tiny extra grid step on 1-TC chips
    try:
        info = pltpu.get_tpu_info()
        cap = getattr(info, "vmem_capacity_bytes", None)
        if isinstance(cap, int) and cap > 0:
            vmem_cap = cap
        for attr in ("num_cores", "tensorcores_per_chip", "core_count"):
            v = getattr(info, attr, None)
            if isinstance(v, int) and v > 0:
                num_cores = v
                break
    except Exception:
        pass
    try:
        v = getattr(jax.devices()[0], "num_cores", None)
        if isinstance(v, int) and v > 0:
            num_cores = v
    except Exception:
        pass
    return vmem_cap, max(1, min(8, num_cores))


def _output_block_budget(vmem_cap):
    # ~8 MiB output blocks on v7x (64 MiB VMEM), ~16 MiB on v5e/v6e (128 MiB).
    return max(2 << 20, min(16 << 20, vmem_cap // 8))


def _vmem_limit(footprint_bytes, vmem_cap):
    limit = max(32 << 20, int(footprint_bytes * 1.25) + (2 << 20))
    return min(limit, max(32 << 20, (vmem_cap * 3) // 4))


def _largest_aligned_divisor(dim, cap, align):
    """Largest multiple of `align` that divides `dim` and is <= cap, or None."""
    t = (min(cap, dim) // align) * align
    while t >= align:
        if dim % t == 0:
            return t
        t -= align
    return None


def _pick_lane_tile(T2, out_budget):
    lane_cap = max(128, ((out_budget // (8 * 4)) // 128) * 128)
    lane_cap = min(lane_cap, 2048)
    if T2 <= lane_cap:
        return T2                            # full dim is always a legal block size
    t = _largest_aligned_divisor(T2, lane_cap, 128)
    return t if t is not None else lane_cap  # uneven edge tiles: Pallas masks them


def _pick_sublane_tile(T1, budget_rows):
    if T1 <= budget_rows:
        return T1
    t = _largest_aligned_divisor(T1, budget_rows, 8)
    return t if t is not None else max(8, (budget_rows // 8) * 8)


def _tree_costs(node):
    """(flops_per_element, transcendentals_per_element) — advisory only."""
    op = node.get("op")
    if op in ("+", "*"):
        f, t = 2 * len(node["values"]), 0
        for v in node["values"]:
            fv, tv = _tree_costs(v)
            f += fv
            t += tv
        return f, t
    table = {"RBF": (4, 1), "ExpSinSq": (6, 2), "Cosine": (2, 1),
             "Linear": (3, 0), "WhiteNoise": (2, 0), "Constant": (0, 0)}
    return table.get(op, (1, 0))


def _gp_cov_flat(x_1, x_2, kernel, B, T1, T2, vmem_cap, num_cores, flops_pe, trans_pe):
    """Lane-dense path for T2 < 128: flatten B*T1*T2 to (P, 128) so output
    stores are unmasked full-lane vst."""
    total = B * T1 * T2
    P = _cdiv(total, 128)
    pad = P * 128 - total
    x1f = jnp.broadcast_to(x_1, (B, T1, T2)).reshape(-1)
    x2f = jnp.broadcast_to(x_2, (B, T1, T2)).reshape(-1)
    if pad:
        x1f = jnp.pad(x1f, (0, pad))
        x2f = jnp.pad(x2f, (0, pad))
    x1f = x1f.reshape(P, 128)
    x2f = x2f.reshape(P, 128)

    budget_rows = max(8, _output_block_budget(vmem_cap) // (3 * 128 * 4))
    target = min(P, budget_rows, max(8, _cdiv(P, num_cores)))
    tr = P if target >= P else max(8, (target // 8) * 8)

    footprint = 2 * 3 * tr * 128 * 4
    cost = pl.CostEstimate(
        flops=(flops_pe + 2) * total,
        transcendentals=trans_pe * total,
        bytes_accessed=4 * (3 * P * 128),
    )
    out = pl.pallas_call(
        kernel,
        out_shape=jax.ShapeDtypeStruct((P, 128), jnp.float32),
        grid=(_cdiv(P, tr),),
        in_specs=[
            pl.BlockSpec((tr, 128), lambda i: (i, 0)),
            pl.BlockSpec((tr, 128), lambda i: (i, 0)),
        ],
        out_specs=pl.BlockSpec((tr, 128), lambda i: (i, 0)),
        compiler_params=pltpu.CompilerParams(
            dimension_semantics=("parallel",),
            vmem_limit_bytes=_vmem_limit(footprint, vmem_cap),
        ),
        cost_estimate=cost,
    )(x1f, x2f)
    out = out.reshape(-1)
    if pad:
        out = out[:total]
    return out.reshape(B, T1, T2)


def _gp_cov_tiled(x_1, x_2, kernel, B, T1, T2, vmem_cap, num_cores, flops_pe, trans_pe):
    out_budget = _output_block_budget(vmem_cap)
    tn = _pick_lane_tile(T2, out_budget)
    budget_rows = max(8, out_budget // (tn * 4))
    tm = _pick_sublane_tile(T1, budget_rows)

    # Fold several batches into one block when the full (T1, T2) plane fits,
    # but never below num_cores batch blocks (keep both v7x TCs busy).
    bb = 1
    if tm == T1 and tn == T2:
        bb_max = max(1, out_budget // (T1 * T2 * 4))
        bb_cap = max(1, B // num_cores) if num_cores > 1 else B
        bb = max(1, min(B, bb_max, bb_cap))
        while B % bb:
            bb -= 1

    grid_b, grid_i, grid_j = B // bb, _cdiv(T1, tm), _cdiv(T2, tn)
    # If B alone cannot provide enough parallel blocks (e.g. B=1 on v7x), split T1.
    if num_cores > 1 and grid_b * grid_i * grid_j < num_cores and tm == T1 and T1 >= 16:
        want = _cdiv(num_cores, grid_b * grid_i * grid_j)
        tm_new = max(8, _round_up(_cdiv(T1, want), 8))
        if tm_new < T1:
            tm = tm_new
            grid_i = _cdiv(T1, tm)

    total = B * T1 * T2
    # Footprint includes the lane-padded (bb, tm, 1)->(bb, tm, 128) x1 block.
    footprint = 2 * (bb * tm * tn * 4
                     + bb * _round_up(tm, 8) * 128 * 4
                     + bb * 8 * _round_up(tn, 128) * 4)
    cost = pl.CostEstimate(
        flops=(flops_pe + 2) * total,
        transcendentals=trans_pe * total,
        bytes_accessed=4 * (total + B * T1 + B * T2),
    )
    return pl.pallas_call(
        kernel,
        out_shape=jax.ShapeDtypeStruct((B, T1, T2), jnp.float32),
        grid=(grid_b, grid_i, grid_j),
        in_specs=[
            pl.BlockSpec((bb, tm, 1), lambda b, i, j: (b, i, 0)),
            pl.BlockSpec((bb, 1, tn), lambda b, i, j: (b, 0, j)),
        ],
        out_specs=pl.BlockSpec((bb, tm, tn), lambda b, i, j: (b, i, j)),
        compiler_params=pltpu.CompilerParams(
            dimension_semantics=("parallel", "parallel", "parallel"),
            vmem_limit_bytes=_vmem_limit(footprint, vmem_cap),
        ),
        cost_estimate=cost,
    )(x_1, x_2)


def gp_covariance(x_1, x_2, tree, mean_prior_sd=0.1, transcendental_dtype=None):
    """x_1: [B, T1, 1], x_2: [B, 1, T2] -> [B, T1, T2] (float32)."""
    B, T1, _ = x_1.shape
    _, _, T2 = x_2.shape
    vmem_cap, num_cores = _tpu_generation_info()
    kernel = make_cov_kernel(tree, mean_prior_sd, transcendental_dtype)
    flops_pe, trans_pe = _tree_costs(tree)
    if T2 < 128:
        return _gp_cov_flat(x_1, x_2, kernel, B, T1, T2, vmem_cap, num_cores,
                            flops_pe, trans_pe)
    return _gp_cov_tiled(x_1, x_2, kernel, B, T1, T2, vmem_cap, num_cores,
                         flops_pe, trans_pe)


# ----------------------------------------------------------------------------
# Faithful pure-JAX reference (transcribes Kernel.forward literally: divides,
# abs, original evaluation order) for correctness checking.
# ----------------------------------------------------------------------------
def _ref_eval(node, x_1, x_2, mean_prior_sd, top_level=True):
    op = node["op"]
    if op == "+":
        t = _ref_eval(node["values"][0], x_1, x_2, mean_prior_sd)
        for v in node["values"][1:]:
            t = t + _ref_eval(v, x_1, x_2, mean_prior_sd, top_level=False)
        result = t
    elif op == "*":
        t = _ref_eval(node["values"][0], x_1, x_2, mean_prior_sd, top_level=False)
        for v in node["values"][1:]:
            t = t * _ref_eval(v, x_1, x_2, mean_prior_sd)
        result = t
    elif op == "Linear":
        c = node["offset"]
        result = (x_1 - c) * (x_2 - c)
    elif op == "WhiteNoise":
        result = (x_1 == x_2).astype(jnp.float32)
    elif op == "RBF":
        l2 = node["lengthscale_sq"]
        result = jnp.exp(-((x_1 - x_2) ** 2) / (2.0 * l2))
    elif op == "ExpSinSq":
        t_, l2 = node["period"], node["lengthscale_sq"]
        result = jnp.exp(-2.0 * jnp.sin(math.pi * jnp.abs(x_1 - x_2) / t_) ** 2 / l2)
    elif op == "Cosine":
        t_ = node["period"]
        result = jnp.cos(2.0 * math.pi * jnp.abs(x_1 - x_2) / t_)
    elif op == "Constant":
        shape = jnp.broadcast_shapes(x_1.shape, x_2.shape)
        result = jnp.full(shape, node["value"], dtype=jnp.float32)
    else:
        raise ParsingError("Cannot parse kernel op " + str(op))
    if top_level:
        result = result + mean_prior_sd ** 2
    return result


# ----------------------------------------------------------------------------
# Main
# ----------------------------------------------------------------------------
if __name__ == "__main__":
    key = jax.random.PRNGKey(0)
    k_params, k_x, k_x2, k_x3 = jax.random.split(key, 4)

    num_base_kernels = 4          # "R*_+l+W" has 4 base kernels
    gp_params_dim = 8

    # Deterministic synthetic raw params (this is __init__'s raw_params arg).
    raw_params = np.asarray(
        jax.random.normal(k_params, (num_base_kernels, gp_params_dim), dtype=jnp.float32)
    )

    expression = "R*_+l+W"        # RBF * Periodic + Linear + WhiteNoise
    mean_prior_sd = 0.1
    parser = KernelParser(expression, raw_params, mean_prior_sd=mean_prior_sd)
    tree = parser.value

    def run_and_check(x, B, T):
        x_1 = x[:, :, None]       # [B, T, 1]
        x_2 = x[:, None, :]       # [B, 1, T]
        cov = gp_covariance(x_1, x_2, tree, mean_prior_sd)
        cov = jax.block_until_ready(cov)
        cov_ref = jax.block_until_ready(_ref_eval(tree, x_1, x_2, mean_prior_sd))
        assert cov.shape == (B, T, T)
        assert not bool(jnp.isnan(cov).any())
        np.testing.assert_allclose(np.asarray(cov), np.asarray(cov_ref), rtol=1e-5, atol=1e-5)

    # Small demo shape (module-consistent): batch=2, num_timesteps=16 (lane-dense flat path).
    B, T = 2, 16
    x_small = jax.random.uniform(k_x, (B, T), dtype=jnp.float32)
    run_and_check(x_small, B, T)

    # Larger shape exercising the 3-D tiled path (full-plane blocks, >=2 parallel blocks).
    B2, T2 = 2, 1024
    x_large = jax.random.uniform(k_x2, (B2, T2), dtype=jnp.float32)
    run_and_check(x_large, B2, T2)

    # Non-128-multiple timesteps / odd batch (full-dim lane block, no masked edge tiles).
    B3, T3 = 3, 160
    x_mid = jax.random.uniform(k_x3, (B3, T3), dtype=jnp.float32)
    run_and_check(x_mid, B3, T3)

    print("KERNEL_OK")
</pallas_src>

<mosaic_0001>
module attributes {stable_mosaic.version = 11 : i64} {
  func.func @cov_kernel(%arg0: i32, %arg1: memref<4x128xf32, #tpu.memory_space<vmem>>, %arg2: memref<4x128xf32, #tpu.memory_space<vmem>>, %arg3: memref<4x128xf32, #tpu.memory_space<vmem>>) attributes {dimension_semantics = [#tpu.dimension_semantics<parallel>], iteration_bounds = array<i64: 1>, scalar_prefetch = 0 : i64, scratch_operands = 0 : i64, tpu.core_type = #tpu.core_type<tc>, window_params = [{transform_indices = @transform_0, window_bounds = array<i64: 4, 128>}, {transform_indices = @transform_1, window_bounds = array<i64: 4, 128>}, {transform_indices = @transform_2, window_bounds = array<i64: 4, 128>}]} {
    %c0 = arith.constant 0 : index
    %c0_0 = arith.constant 0 : index
    %0 = vector.load %arg1[%c0, %c0_0] : memref<4x128xf32, #tpu.memory_space<vmem>>, vector<4x128xf32>
    %c0_1 = arith.constant 0 : index
    %c0_2 = arith.constant 0 : index
    %1 = vector.load %arg2[%c0_1, %c0_2] : memref<4x128xf32, #tpu.memory_space<vmem>>, vector<4x128xf32>
    %2 = arith.subf %0, %1 : vector<4x128xf32>
    %3 = arith.mulf %2, %2 : vector<4x128xf32>
    %cst = arith.constant -1.29046321 : f32
    %4 = vector.broadcast %cst : f32 to vector<4x128xf32>
    %5 = arith.mulf %3, %4 : vector<4x128xf32>
    %cst_3 = arith.constant 12.6915064 : f32
    %6 = vector.broadcast %cst_3 : f32 to vector<4x128xf32>
    %7 = arith.mulf %2, %6 : vector<4x128xf32>
    %8 = math.sin %7 : vector<4x128xf32>
    %9 = arith.mulf %8, %8 : vector<4x128xf32>
    %cst_4 = arith.constant -9.8540163 : f32
    %10 = vector.broadcast %cst_4 : f32 to vector<4x128xf32>
    %11 = arith.mulf %9, %10 : vector<4x128xf32>
    %12 = math.exp %11 : vector<4x128xf32>
    %cst_5 = arith.constant 0.00999999977 : f32
    %13 = vector.broadcast %cst_5 : f32 to vector<4x128xf32>
    %14 = arith.addf %12, %13 : vector<4x128xf32>
    %15 = math.exp %5 : vector<4x128xf32>
    %16 = arith.mulf %14, %15 : vector<4x128xf32>
    %cst_6 = arith.constant 0.00999999977 : f32
    %17 = vector.broadcast %cst_6 : f32 to vector<4x128xf32>
    %18 = arith.addf %16, %17 : vector<4x128xf32>
    %cst_7 = arith.constant 0.986470937 : f32
    %19 = vector.broadcast %cst_7 : f32 to vector<4x128xf32>
    %20 = arith.subf %0, %19 : vector<4x128xf32>
    %cst_8 = arith.constant 0.986470937 : f32
    %21 = vector.broadcast %cst_8 : f32 to vector<4x128xf32>
    %22 = arith.subf %1, %21 : vector<4x128xf32>
    %23 = arith.mulf %20, %22 : vector<4x128xf32>
    %24 = arith.cmpf oeq, %0, %1 : vector<4x128xf32>
    %25 = arith.extui %24 : vector<4x128xi1> to vector<4x128xi32>
    %26 = arith.sitofp %25 : vector<4x128xi32> to vector<4x128xf32>
    %27 = arith.addf %18, %23 : vector<4x128xf32>
    %28 = arith.addf %27, %26 : vector<4x128xf32>
    %cst_9 = arith.constant 0.00999999977 : f32
    %29 = vector.broadcast %cst_9 : f32 to vector<4x128xf32>
    %30 = arith.addf %28, %29 : vector<4x128xf32>
    %c0_10 = arith.constant 0 : index
    %c0_11 = arith.constant 0 : index
    %31 = vector.load %arg3[%c0_10, %c0_11] : memref<4x128xf32, #tpu.memory_space<vmem>>, vector<4x128xf32>
    tpu.vector_store %arg3[%c0_10, %c0_11], %30 {strides = array<i32>} : memref<4x128xf32, #tpu.memory_space<vmem>>, vector<4x128xf32>,
    return
  }
  func.func @transform_0(%arg0: i32) -> (i32, i32) {
    %c0_i32 = arith.constant 0 : i32
    %c0_i32_0 = arith.constant 0 : i32
    return %arg0, %c0_i32 : i32, i32
  }
  func.func @transform_1(%arg0: i32) -> (i32, i32) {
    %c0_i32 = arith.constant 0 : i32
    %c0_i32_0 = arith.constant 0 : i32
    return %arg0, %c0_i32 : i32, i32
  }
  func.func @transform_2(%arg0: i32) -> (i32, i32) {
    %c0_i32 = arith.constant 0 : i32
    %c0_i32_0 = arith.constant 0 : i32
    return %arg0, %c0_i32 : i32, i32
  }
}

</mosaic_0001>

<bundles_post_ra>
// kernel: tpu_custom_call.1
= control target key start
LH: loop header
LB: loop body
LE: loop exit
PB: predicated region body
PF: predicated region fallthrough
CT: control target
= control target key end

     0   :  { %7 = vsyncpa [#allocation3], 0  ;;  %s352_s0 = inlined_call_operand.hbm [shape: f32[4,128], index: 0, kind: input, shape index: {}]   ;;  %s353_s1 = inlined_call_operand.hbm [shape: f32[4,128], index: 1, kind: input, shape index: {}]   ;;  %s354_s2 = inlined_call_operand.hbm [shape: f32[4,128], index: 2, kind: output, shape index: {}]  }
   0x1   :  { %8 = vsyncpa [#allocation6], 0 }
   0x2   :  { %9 = vsyncpa [#allocation4], 0  ;;  %s276_s9 = smov [#allocation2]   ;;  %s277_s11 = smov [#allocation5]  }
   0x3   :  { %s16_s10 = sshll.u32 %s276_s9, 4  ;;  %s26_s12 = sshll.u32 %s277_s11, 4  ;;  %s17_s10 = int_to_ptr.vmem [resolvable:$true] %s16_s10  ;;  %s27_s12 = int_to_ptr.vmem [resolvable:$true] %s26_s12 }
   0x4   :  { %s218_s13 = scalar_lea.vmem %s17_s10, 64  ;;  %p223_p1 = scmp.lt.s32.totalorder %s17_s10, %s17_s10 }
   0x5   :  { %p219_p0 = scmp.ne.s32.totalorder %s17_s10, %s218_s13  ;;  %p224_p2 = scmp.lt.s32.totalorder %s218_s13, %s218_s13 }
   0x7   :  { %p225_p3 = por %p224_p2, %p223_p1 }
   0x9   :  { %p226_p4 = pnand %p225_p3, %p219_p0 }
   0xb   :  { %229 = shalt.err (!%p226_p4)
}
   0xc   :  { %19 = dma.hbm_to_vmem [thread:$0]  %s352_s0, 64, %s17_s10, [#allocation3]  }
   0xd   :  { %s238_s16 = scalar_lea.vmem %s27_s12, 64  ;;  %p243_p6 = scmp.lt.s32.totalorder %s27_s12, %s27_s12 }
   0xe   :  { %p239_p5 = scmp.ne.s32.totalorder %s27_s12, %s238_s16  ;;  %p244_p7 = scmp.lt.s32.totalorder %s238_s16, %s238_s16 }
  0x10   :  { %p245_p8 = por %p244_p7, %p243_p6 }
  0x12   :  { %p246_p9 = pnand %p245_p8, %p239_p5 }
  0x14   :  { %249 = shalt.err (!%p246_p9)
}
  0x15   :  { %29 = dma.hbm_to_vmem [thread:$0]  %s353_s1, 64, %s27_s12, [#allocation6]  }
  0x16   :  { %270 = dma.done.wait [#allocation3], 64  }
  0x17   :  { %271 = vsyncadd [#allocation3], 4294967232 }
  0x18   :  { %272 = dma.done.wait [#allocation6], 64  }
  0x19   :  { %273 = vsyncadd [#allocation6], 4294967232  ;;  %v307_v0 = vld [vmem:[#allocation2] sm:$0xf]  ;;  %v309_v1 = vld [vmem:[#allocation5] sm:$0xf] }
  0x1a   :  { %v313_v2 = vsub.f32 %v307_v0, %v309_v1  ;;  %v185_v3 = vadd.f32 -0.98647094, %v307_v0  ;;  %v186_v4 = vadd.f32 -0.98647094, %v309_v1  ;;  %vm158_vm0 = vcmp.eq.f32.partialorder %v307_v0, %v309_v1  ;;  %s285_s0 = smov [#allocation7]  }
  0x1b   :  { %v278_v18 = vmov 683565275   ;;  %v279_v20 = vmov 2475754826   ;;  %v280_v22 = vmov 2131351028  }
  0x1c   :  { %v320_v5 = vmul.f32 12.691506, %v313_v2  ;;  %v322_v6 = vmul.f32 %v186_v4, %v185_v3  ;;  %v281_v24 = vmov 2102212464   ;;  %v282_v26 = vmov 920167782  }
  0x1d   :  { %v283_v33 = vmov 1326507024   ;;  %s171_s1 = sshll.u32 %s285_s0, 4  ;;  %s172_s1 = int_to_ptr.vmem [resolvable:$true] %s171_s1 }
  0x1e   :  { %v45_v7 = vand.u32 2139095040, %v320_v5  ;;  %v42_v9 = vand.u32 2147483647, %v320_v5  ;;  %vm44_vm8 = vcmp.lt.s32.totalorder %v320_v5, 0  ;;  %vm134_vm13 = vweird.f32 %v320_v5  ;;  %s250_s19 = scalar_lea.vmem %s172_s1, 64  ;;  %p255_p11 = scmp.lt.s32.totalorder %s172_s1, %s172_s1 }
  0x1f   :  { %p251_p10 = scmp.ne.s32.totalorder %s172_s1, %s250_s19  ;;  %p256_p12 = scmp.lt.s32.totalorder %s250_s19, %s250_s19 }
  0x20   :  { %v46_v8 = vshrl.u32 %v45_v7, 23  ;;  %v49_v12 = vand.u32 8388607, %v42_v9  ;;  %vm43_vm9 = vcmp.le.f32.partialorder %v42_v9, 0.7853982 }
  0x21   :  { %p257_p13 = por %p256_p12, %p255_p11 }
  0x22   :  { %v181_v10 = vadd.s32 4294967169, %v46_v8  ;;  %v50_v15 = vor.u32 8388608, %v49_v12 }
  0x23   :  { %p258_p0 = pnand %p257_p13, %p251_p10 }
  0x24   :  { %v52_v11 = vadd.s32 1, %v181_v10  ;;  %v90_v35 = vshll.u32 %v50_v15, 8 }
  0x26   :  { %vm53_vm1 = vcmp.gt.s32.totalorder %v52_v11, 0 }
  0x27   :  { %v54_v13 = vsel %vm53_vm1, %v52_v11, 0 }
  0x28   :  { %v56_v14 = vand.u32 31, %v54_v13  ;;  %v55_v16 = vshrl.u32 %v54_v13, 5 }
  0x2a   :  { %v57_v17 = vsub.s32 32, %v56_v14  ;;  %v59_v19 = vshll.u32 %v278_v18, %v56_v14  ;;  %v62_v21 = vshll.u32 %v279_v20, %v56_v14  ;;  %v65_v23 = vshll.u32 %v280_v22, %v56_v14 }
  0x2b   :  { %v68_v25 = vshll.u32 %v281_v24, %v56_v14  ;;  %v71_v27 = vshll.u32 %v282_v26, %v56_v14  ;;  %vm74_vm2 = vcmp.lt.s32.totalorder %v55_v16, 1  ;;  %vm77_vm3 = vcmp.lt.s32.totalorder %v55_v16, 4 }
  0x2c   :  { %v58_v28 = vshrl.u32 %v278_v18, %v57_v17  ;;  %v60_v29 = vshrl.u32 %v279_v20, %v57_v17  ;;  %v63_v30 = vshrl.u32 %v280_v22, %v57_v17  ;;  %v66_v31 = vshrl.u32 %v281_v24, %v57_v17 }
  0x2d   :  { %v69_v32 = vshrl.u32 %v282_v26, %v57_v17  ;;  %v72_v34 = vshrl.u32 %v283_v33, %v57_v17  ;;  %vm75_vm4 = vcmp.lt.s32.totalorder %v55_v16, 2  ;;  %vm76_vm5 = vcmp.lt.s32.totalorder %v55_v16, 3 }
  0x2e   :  { %v61_v36 = vor.u32 %v60_v29, %v59_v19  ;;  %v64_v37 = vor.u32 %v63_v30, %v62_v21  ;;  %v67_v38 = vor.u32 %v66_v31, %v65_v23  ;;  %v39_v33 = vmul.f32 %v313_v2, %v313_v2 }
  0x2f   :  { %v70_v39 = vor.u32 %v69_v32, %v68_v25  ;;  %v73_v40 = vor.u32 %v72_v34, %v71_v27 }
  0x30   :  { %v78_v41 = vsel %vm74_vm2, %v58_v28, %v61_v36  ;;  %v79_v42 = vsel %vm77_vm3, %v67_v38, 2102212464  ;;  %v82_v43 = vsel %vm74_vm2, %v61_v36, %v64_v37  ;;  %v86_v44 = vsel %vm74_vm2, %v64_v37, %v67_v38 }
  0x31   :  { %v80_v45 = vsel %vm76_vm5, %v64_v37, %v79_v42  ;;  %v83_v46 = vsel %vm77_vm3, %v70_v39, 920167782  ;;  %v87_v47 = vsel %vm77_vm3, %v73_v40, 1326507024  ;;  %v40_v37 = vmul.f32 -1.2904632, %v39_v33 }
  0x32   :  { %v84_v48 = vsel %vm76_vm5, %v67_v38, %v83_v46  ;;  %v88_v49 = vsel %vm76_vm5, %v70_v39, %v87_v47  ;;  %v81_v50 = vsel %vm75_vm4, %v78_v41, %v80_v45 }
  0x33   :  { %v85_v51 = vsel %vm75_vm4, %v82_v43, %v84_v48  ;;  %v89_v52 = vsel %vm75_vm4, %v86_v44, %v88_v49  ;;  %v97_v57 = vmul.u32 %v90_v35, %v81_v50  ;;  %v151_v42 = vmul.f32 1.442695, %v40_v37 }
  0x34   :  { %v328_v53 = vmul.u32.u64.low %v90_v35, %v89_v52  ;;  %v329_v54 = vmul.u32.u64.high %v90_v35, %v89_v52, %v328_v53  ;;  %v331_v55 = vmul.u32.u64.low %v90_v35, %v85_v51  ;;  %v332_v56 = vmul.u32.u64.high %v90_v35, %v85_v51, %v331_v55 }
  0x35   :  { %v284_v49 = vmov 0.0  }
  0x36   :  { %vm99_vm6 = vc.u32 %v329_v54, %v331_v55  ;;  %v100_v58 = vadd.s32 1, %v332_v56  ;;  %v98_v11 = vadd.s32 %v331_v55, %v329_v54 }
  0x38   :  { %v101_v59 = vsel %vm99_vm6, %v100_v58, %v332_v56 }
  0x39   :  { %v102_v60 = vadd.s32 %v101_v59, %v97_v57 }
  0x3b   :  { %v103_v61 = vadd.s32 536870912, %v102_v60 }
  0x3d   :  { %v104_v62 = vshrl.u32 %v103_v61, 30 }
  0x3f   :  { %v105_v63 = vshll.u32 %v104_v62, 30  ;;  %v128_v24 = vsub.s32 4, %v104_v62 }
  0x41   :  { %v106_v3 = vsub.s32 %v102_v60, %v105_v63  ;;  %v129_v27 = vsel %vm44_vm8, %v128_v24, %v104_v62 }
  0x42   :  { %v131_v29 = vsel %vm43_vm9, 0, %v129_v27 }
  0x43   :  { %v108_v4 = vsub.s32 0, %v106_v3  ;;  %v135_v30 = vadd.s32 3, %v131_v29 }
  0x45   :  { %v182_v7 = vmin.u32 %v108_v4, %v106_v3  ;;  %v136_v31 = vand.u32 3, %v135_v30 }
  0x47   :  { %v110_v8 = vclz %v182_v7  ;;  %vm141_vm10 = vcmp.eq.s32.totalorder %v136_v31, 2  ;;  %vm138_vm11 = vcmp.eq.s32.totalorder %v136_v31, 0  ;;  %vm137_vm12 = vcmp.lt.s32.totalorder %v136_v31, 2 }
  0x49   :  { %v183_v10 = vadd.s32 4294967294, %v110_v8 }
  0x4b   :  { %vm184_vm7 = vcmp.lt.s32.totalorder %v183_v10, 0 }
  0x4c   :  { %v113_v12 = vsel %vm184_vm7, 0, %v183_v10 }
  0x4d   :  { %v114_v13 = vsub.s32 32, %v113_v12  ;;  %v115_v14 = vshll.u32 %v106_v3, %v113_v12  ;;  %v118_v15 = vsub.s32 4294967266, %v113_v12 }
  0x4f   :  { %v116_v16 = vshrl.u32 %v98_v11, %v114_v13  ;;  %v119_v17 = vadd.s32 127, %v118_v15 }
  0x51   :  { %v117_v18 = vor.u32 %v116_v16, %v115_v14  ;;  %v120_v19 = vshll.u32 %v119_v17, 23 }
  0x53   :  { %v121_v20 = vor.u32 4788187, %v120_v19  ;;  %v124_v21 = vcvt.s32.f32 %v117_v18 }
  0x55   :  { %v122_v22 = vand.u32 2147483647, %v121_v20 }
  0x57   :  { %v125_v23 = vmul.f32 %v124_v21, %v122_v22 }
  0x59   :  { %v126_v25 = vxor.u32 2147483648, %v125_v23 }
  0x5b   :  { %v127_v26 = vsel %vm44_vm8, %v126_v25, %v125_v23 }
  0x5c   :  { %v130_v28 = vsel %vm43_vm9, %v320_v5, %v127_v26  ;;  %v187_v5 = vsel %vm158_vm0, 1.0, %v284_v49 }
  0x5d   :  { %202 = vcosq.f32 %v130_v28 }
  0x5e   :  { %204 = vsinq.f32 %v130_v28 }
  0x5f   :  { %206 = vpow2.f32 %v151_v42 }
  0x6a   :  { %v203_v32 = vpop.eup %202 }
  0x6b   :  { %v205_v34 = vpop.eup %204  ;;  %v142_v35 = vxor.u32 2147483648, %v203_v32 }
  0x6c   :  { %v139_v9 = vxor.u32 2147483648, %v205_v34  ;;  %v207_v2 = vpop.eup %206 }
  0x6d   :  { %v143_v36 = vsel %vm141_vm10, %v142_v35, %v205_v34 }
  0x6e   :  { %v140_v38 = vsel %vm138_vm11, %v203_v32, %v139_v9 }
  0x6f   :  { %v144_v39 = vsel %vm137_vm12, %v140_v38, %v143_v36 }
  0x70   :  { %v145_v40 = vsel %vm134_vm13, nan, %v144_v39 }
  0x71   :  { %v146_v41 = vmul.f32 %v145_v40, %v145_v40 }
  0x73   :  { %v147_v43 = vmul.f32 -9.854016, %v146_v41 }
  0x75   :  { %v148_v44 = vmul.f32 1.442695, %v147_v43 }
  0x77   :  { %208 = vpow2.f32 %v148_v44 }
  0x84   :  { %v209_v45 = vpop.eup %208 }
  0x85   :  { %v150_v46 = vadd.f32 0.01, %v209_v45 }
  0x87   :  { %v153_v47 = vmul.f32 %v207_v2, %v150_v46 }
  0x89   :  { %v154_v48 = vadd.f32 0.01, %v153_v47 }
  0x8b   :  { %v161_v50 = vadd.f32 %v322_v6, %v154_v48 }
  0x8d   :  { %v162_v51 = vadd.f32 %v187_v5, %v161_v50 }
  0x8f   :  { %v163_v52 = vadd.f32 0.01, %v162_v51 }
  0x91   :  { %164 = vst [vmem:[#allocation7] sm:$0xf] %v163_v52 }
  0x92   :  { %261 = shalt.err (!%p258_p0)
}
  0x93   :  { %174 = dma.vmem_to_hbm [thread:$0]  %s172_s1, 64, %s354_s2, [#allocation4]  }
  0x94   :  { %274 = dma.done.wait [#allocation4], 64  }
  0x95   :  { %275 = vsyncadd [#allocation4], 4294967232 }
  0x96   :  { %178 = vsyncpa [#allocation3], 1 }
  0x97   :  { %179 = vsyncpa [#allocation6], 1 }
  0x98   :  { %180 = vsyncpa [#allocation4], 1 }

</bundles_post_ra>
